<compile_context>
chip_gen: v7x
topology: tpu7x:2x2x1
jax: 0.10.0
libtpu: 0.0.40
codegen_flags: <defaults>
</compile_context>

<pallas_src>
import jax
import jax.numpy as jnp
from jax.experimental import pallas as pl
from jax.experimental.pallas import tpu as pltpu

IN_FEATURES = 28 * 28   # 784 (divisible by 8; used directly as the block dim)
OUT_FEATURES = 10
OUT_PAD = 128           # lane-dense output block
LANE = 128
SUBLANE = 8


def _round_up(x, m):
    return (x + m - 1) // m * m


def mlp_kernel(x_ref, w1_ref, b1_ref, w2_ref, b2_ref, w3_ref, b3_ref, o_ref):
    # Layer 1: Linear(784 -> Hp) + ReLU. x arrives f32; cast to bf16 for the
    # MXU inside the kernel (avoids a separate XLA pad/cast pass over x).
    x = x_ref[...].astype(jnp.bfloat16)                               # (TB, 784)
    h1 = jnp.dot(x, w1_ref[...], preferred_element_type=jnp.float32) + b1_ref[...]
    h1 = jnp.maximum(h1, 0.0).astype(jnp.bfloat16)
    # Layer 2: Linear(Hp -> Hp) + ReLU
    h2 = jnp.dot(h1, w2_ref[...], preferred_element_type=jnp.float32) + b2_ref[...]
    h2 = jnp.maximum(h2, 0.0).astype(jnp.bfloat16)
    # Layer 3: Linear(Hp -> 128-padded 10), no activation
    o_ref[...] = (
        jnp.dot(h2, w3_ref[...], preferred_element_type=jnp.float32) + b3_ref[...]
    ).astype(o_ref.dtype)


def prepare_params(params):
    """Hoisted weight prep (call once, reuse every forward).

    Transposes PyTorch (out, in) weights to (in, out), zero-pads the hidden /
    output dims to lane multiples, casts weights to bf16 for the MXU. Biases
    stay f32 (added to the f32 accumulator). Zero padding is exact: padded
    hidden columns are relu(0 + 0) = 0 and padded output columns are sliced
    away by the wrapper.
    """
    H = params["W1"].shape[0]
    Hp = _round_up(H, LANE)

    w1 = jnp.pad(params["W1"].T.astype(jnp.float32),
                 ((0, 0), (0, Hp - H))).astype(jnp.bfloat16)                      # (784, Hp)
    w2 = jnp.pad(params["W2"].T.astype(jnp.float32),
                 ((0, Hp - H), (0, Hp - H))).astype(jnp.bfloat16)                 # (Hp, Hp)
    w3 = jnp.pad(params["W3"].T.astype(jnp.float32),
                 ((0, Hp - H), (0, OUT_PAD - OUT_FEATURES))).astype(jnp.bfloat16)  # (Hp, 128)
    b1 = jnp.pad(params["b1"].astype(jnp.float32), (0, Hp - H)).reshape(1, Hp)
    b2 = jnp.pad(params["b2"].astype(jnp.float32), (0, Hp - H)).reshape(1, Hp)
    b3 = jnp.pad(params["b3"].astype(jnp.float32),
                 (0, OUT_PAD - OUT_FEATURES)).reshape(1, OUT_PAD)
    # TODO(synk): int8 weights (per-column scales) on v5e/v6e and fp8 on v7x
    # would halve/quarter resident-weight VMEM + DMA for large n_neurons.
    return {"w1": w1, "b1": b1, "w2": w2, "b2": b2, "w3": w3, "b3": b3}


def _vmem_capacity_bytes():
    try:
        return int(pltpu.get_tpu_info().vmem_capacity_bytes)
    except Exception:
        return 64 * 1024 * 1024   # conservative: v7x physical per-core VMEM


def _build_call(B8, TB, Hp, vmem_limit, cost, single_buffer_weights):
    if single_buffer_weights:
        def resident(shape):
            # Constant index_map -> stays VMEM-resident across grid steps;
            # Buffered(1) drops the second pipeline buffer (halves weight VMEM).
            return pl.BlockSpec(shape, lambda i: (0, 0), pipeline_mode=pl.Buffered(1))
    else:
        def resident(shape):
            return pl.BlockSpec(shape, lambda i: (0, 0))

    return pl.pallas_call(
        mlp_kernel,
        out_shape=jax.ShapeDtypeStruct((B8, OUT_PAD), jnp.float32),
        grid=(pl.cdiv(B8, TB),),
        in_specs=[
            pl.BlockSpec((TB, IN_FEATURES), lambda i: (i, 0)),   # x: batch-tiled (f32)
            resident((IN_FEATURES, Hp)),                         # W1: resident
            resident((1, Hp)),                                   # b1
            resident((Hp, Hp)),                                  # W2: resident
            resident((1, Hp)),                                   # b2
            resident((Hp, OUT_PAD)),                             # W3: resident
            resident((1, OUT_PAD)),                              # b3
        ],
        out_specs=pl.BlockSpec((TB, OUT_PAD), lambda i: (i, 0)),
        compiler_params=pltpu.CompilerParams(
            dimension_semantics=("parallel",),
            vmem_limit_bytes=vmem_limit,
        ),
        cost_estimate=cost,
    )


def neuralnet_2layers_forward(x, prep, *, tb=512):
    """Pallas forward matching NeuralNet_2layers.forward.

    x:    any shape whose trailing dims flatten to 784 per example.
    prep: output of prepare_params(params).
    """
    x2 = x.reshape(-1, IN_FEATURES).astype(jnp.float32)   # x.view(-1, 784)
    B = x2.shape[0]
    Hp = prep["w1"].shape[1]

    # Pad batch only to the 8-row sublane granularity (<= 7 wasted rows).
    B8 = _round_up(B, SUBLANE)
    if B8 != B:
        x2 = jnp.pad(x2, ((0, B8 - B), (0, 0)))

    # Batch tile: multiple of 8 sublanes, capped at `tb`; when the batch is
    # large enough, pick TB <= B8/2 so the grid has >=2 independent tiles
    # (megacore sharding on v7x). Ragged last tiles are handled by Pallas.
    if B8 <= 2 * SUBLANE:
        TB = B8
    else:
        TB = max(SUBLANE, min(tb, _round_up(pl.cdiv(B8, 2), SUBLANE)))

    flops = 2 * B8 * (IN_FEATURES * Hp + Hp * Hp + Hp * OUT_PAD)
    bytes_accessed = (
        B8 * IN_FEATURES * 4
        + (prep["w1"].size + prep["w2"].size + prep["w3"].size) * 2
        + (prep["b1"].size + prep["b2"].size + prep["b3"].size) * 4
        + B8 * OUT_PAD * 4
    )
    cost = pl.CostEstimate(flops=flops, transcendentals=0,
                           bytes_accessed=bytes_accessed)

    # Computed VMEM budget: double-buffered x/out tiles, single-buffered bf16
    # weights + f32 biases, plus hidden-activation temporaries; capped with
    # headroom below the per-core physical capacity (critical on v7x: 64 MiB).
    needed = (
        2 * TB * IN_FEATURES * 4                              # x double-buffer
        + 2 * TB * OUT_PAD * 4                                # out double-buffer
        + (IN_FEATURES * Hp + Hp * Hp + Hp * OUT_PAD) * 2     # bf16 weights (x1)
        + (2 * Hp + OUT_PAD) * 4                              # f32 biases
        + 4 * TB * Hp * 4                                     # h1/h2 temporaries
    )
    vmem_limit = int(min(max(needed * 5 // 4, 32 * 1024 * 1024),
                         _vmem_capacity_bytes() * 7 // 8))
    # TODO(synk): if the weights alone exceed the VMEM budget (very large
    # n_neurons), the Hp reduction dim would need K-tiling with an accumulator.

    args = (x2, prep["w1"], prep["b1"], prep["w2"], prep["b2"],
            prep["w3"], prep["b3"])
    try:
        out = _build_call(B8, TB, Hp, vmem_limit, cost, True)(*args)
    except Exception:
        # Fallback for jax versions without BlockSpec(pipeline_mode=...).
        out = _build_call(B8, TB, Hp, vmem_limit, cost, False)(*args)

    out = out[:B, :OUT_FEATURES]
    # x.squeeze(): drops size-1 dims (batch of 1 -> (10,)); no-op for B > 1.
    return jnp.squeeze(out)


def init_params(key, n_neurons):
    """Deterministic init mimicking nn.Linear default (U(-1/sqrt(fan_in), +))."""
    ks = jax.random.split(key, 6)

    def linear(kw, kb, fan_in, fan_out):
        bound = 1.0 / jnp.sqrt(fan_in)
        W = jax.random.uniform(kw, (fan_out, fan_in), jnp.float32, -bound, bound)
        b = jax.random.uniform(kb, (fan_out,), jnp.float32, -bound, bound)
        return W, b

    W1, b1 = linear(ks[0], ks[1], IN_FEATURES, n_neurons)
    W2, b2 = linear(ks[2], ks[3], n_neurons, n_neurons)
    W3, b3 = linear(ks[4], ks[5], n_neurons, 10)
    return {"W1": W1, "b1": b1, "W2": W2, "b2": b2, "W3": W3, "b3": b3}


def reference_forward(x, params):
    """Pure-JAX reference with the same bf16-input / f32-accumulate numerics."""
    hp = jax.lax.Precision.HIGHEST

    def r(a):  # emulate the kernel's bf16 rounding of MXU inputs
        return a.astype(jnp.bfloat16).astype(jnp.float32)

    x2 = r(x.reshape(-1, IN_FEATURES).astype(jnp.float32))
    h1 = jnp.maximum(jnp.dot(x2, r(params["W1"]).T, precision=hp) + params["b1"], 0.0)
    h2 = jnp.maximum(jnp.dot(r(h1), r(params["W2"]).T, precision=hp) + params["b2"], 0.0)
    out = jnp.dot(r(h2), r(params["W3"]).T, precision=hp) + params["b3"]
    return jnp.squeeze(out)


if __name__ == "__main__":
    key = jax.random.PRNGKey(0)
    k_x, k_p = jax.random.split(key)

    batch, n_neurons = 2, 32
    # MNIST-like input in NCHW; forward flattens it to (batch, 784).
    x = jax.random.normal(k_x, (batch, 1, 28, 28), dtype=jnp.float32)
    params = init_params(k_p, n_neurons)

    prep = prepare_params(params)  # hoisted: transpose/pad/cast done once
    out = neuralnet_2layers_forward(x, prep)
    out = jax.block_until_ready(out)

    ref = reference_forward(x, params)
    assert out.shape == ref.shape == (batch, 10)
    assert jnp.allclose(out, ref, atol=1e-2, rtol=1e-2), (
        float(jnp.max(jnp.abs(out - ref)))
    )

    print("KERNEL_OK")
</pallas_src>

<mosaic_0001>
module attributes {stable_mosaic.version = 11 : i64} {
  func.func @mlp_kernel(%arg0: i32, %arg1: memref<8x784xf32, #tpu.memory_space<vmem>>, %arg2: memref<784x128xbf16, #tpu.memory_space<vmem>>, %arg3: memref<1x128xf32, #tpu.memory_space<vmem>>, %arg4: memref<128x128xbf16, #tpu.memory_space<vmem>>, %arg5: memref<1x128xf32, #tpu.memory_space<vmem>>, %arg6: memref<128x128xbf16, #tpu.memory_space<vmem>>, %arg7: memref<1x128xf32, #tpu.memory_space<vmem>>, %arg8: memref<8x128xf32, #tpu.memory_space<vmem>>) attributes {dimension_semantics = [#tpu.dimension_semantics<parallel>], iteration_bounds = array<i64: 1>, scalar_prefetch = 0 : i64, scratch_operands = 0 : i64, tpu.core_type = #tpu.core_type<tc>, window_params = [{transform_indices = @transform_0, window_bounds = array<i64: 8, 784>}, {pipeline_mode = #tpu.pipeline_mode<synchronous>, transform_indices = @transform_1, window_bounds = array<i64: 784, 128>}, {pipeline_mode = #tpu.pipeline_mode<synchronous>, transform_indices = @transform_2, window_bounds = array<i64: 1, 128>}, {pipeline_mode = #tpu.pipeline_mode<synchronous>, transform_indices = @transform_3, window_bounds = array<i64: 128, 128>}, {pipeline_mode = #tpu.pipeline_mode<synchronous>, transform_indices = @transform_4, window_bounds = array<i64: 1, 128>}, {pipeline_mode = #tpu.pipeline_mode<synchronous>, transform_indices = @transform_5, window_bounds = array<i64: 128, 128>}, {pipeline_mode = #tpu.pipeline_mode<synchronous>, transform_indices = @transform_6, window_bounds = array<i64: 1, 128>}, {transform_indices = @transform_7, window_bounds = array<i64: 8, 128>}]} {
    %c0 = arith.constant 0 : index
    %c0_0 = arith.constant 0 : index
    %0 = vector.load %arg1[%c0, %c0_0] : memref<8x784xf32, #tpu.memory_space<vmem>>, vector<8x784xf32>
    %1 = arith.truncf %0 : vector<8x784xf32> to vector<8x784xbf16>
    %c0_1 = arith.constant 0 : index
    %c0_2 = arith.constant 0 : index
    %2 = vector.load %arg2[%c0_1, %c0_2] : memref<784x128xbf16, #tpu.memory_space<vmem>>, vector<784x128xbf16>
    %cst = arith.constant dense<0.000000e+00> : vector<8x128xf32>
    %3 = tpu.matmul %1, %2, %cst {dimension_numbers = #tpu.dot_dimension_numbers<[1], [0], [0], [1], [0, 0, 1, 1], [], []>} : vector<8x784xbf16>, vector<784x128xbf16>, vector<8x128xf32> -> vector<8x128xf32>
    %c0_3 = arith.constant 0 : index
    %c0_4 = arith.constant 0 : index
    %4 = vector.load %arg3[%c0_3, %c0_4] : memref<1x128xf32, #tpu.memory_space<vmem>>, vector<1x128xf32>
    %5 = vector.broadcast %4 : vector<1x128xf32> to vector<8x128xf32>
    %6 = arith.addf %3, %5 : vector<8x128xf32>
    %cst_5 = arith.constant 0.000000e+00 : f32
    %7 = vector.broadcast %cst_5 : f32 to vector<8x128xf32>
    %8 = arith.maximumf %6, %7 : vector<8x128xf32>
    %9 = arith.truncf %8 : vector<8x128xf32> to vector<8x128xbf16>
    %c0_6 = arith.constant 0 : index
    %c0_7 = arith.constant 0 : index
    %10 = vector.load %arg4[%c0_6, %c0_7] : memref<128x128xbf16, #tpu.memory_space<vmem>>, vector<128x128xbf16>
    %cst_8 = arith.constant dense<0.000000e+00> : vector<8x128xf32>
    %11 = tpu.matmul %9, %10, %cst_8 {dimension_numbers = #tpu.dot_dimension_numbers<[1], [0], [0], [1], [0, 0, 1, 1], [], []>} : vector<8x128xbf16>, vector<128x128xbf16>, vector<8x128xf32> -> vector<8x128xf32>
    %c0_9 = arith.constant 0 : index
    %c0_10 = arith.constant 0 : index
    %12 = vector.load %arg5[%c0_9, %c0_10] : memref<1x128xf32, #tpu.memory_space<vmem>>, vector<1x128xf32>
    %13 = vector.broadcast %12 : vector<1x128xf32> to vector<8x128xf32>
    %14 = arith.addf %11, %13 : vector<8x128xf32>
    %cst_11 = arith.constant 0.000000e+00 : f32
    %15 = vector.broadcast %cst_11 : f32 to vector<8x128xf32>
    %16 = arith.maximumf %14, %15 : vector<8x128xf32>
    %17 = arith.truncf %16 : vector<8x128xf32> to vector<8x128xbf16>
    %c0_12 = arith.constant 0 : index
    %c0_13 = arith.constant 0 : index
    %18 = vector.load %arg6[%c0_12, %c0_13] : memref<128x128xbf16, #tpu.memory_space<vmem>>, vector<128x128xbf16>
    %cst_14 = arith.constant dense<0.000000e+00> : vector<8x128xf32>
    %19 = tpu.matmul %17, %18, %cst_14 {dimension_numbers = #tpu.dot_dimension_numbers<[1], [0], [0], [1], [0, 0, 1, 1], [], []>} : vector<8x128xbf16>, vector<128x128xbf16>, vector<8x128xf32> -> vector<8x128xf32>
    %c0_15 = arith.constant 0 : index
    %c0_16 = arith.constant 0 : index
    %20 = vector.load %arg7[%c0_15, %c0_16] : memref<1x128xf32, #tpu.memory_space<vmem>>, vector<1x128xf32>
    %21 = vector.broadcast %20 : vector<1x128xf32> to vector<8x128xf32>
    %22 = arith.addf %19, %21 : vector<8x128xf32>
    %c0_17 = arith.constant 0 : index
    %c0_18 = arith.constant 0 : index
    %23 = vector.load %arg8[%c0_17, %c0_18] : memref<8x128xf32, #tpu.memory_space<vmem>>, vector<8x128xf32>
    tpu.vector_store %arg8[%c0_17, %c0_18], %22 {strides = array<i32>} : memref<8x128xf32, #tpu.memory_space<vmem>>, vector<8x128xf32>,
    return
  }
  func.func @transform_0(%arg0: i32) -> (i32, i32) {
    %c0_i32 = arith.constant 0 : i32
    %c0_i32_0 = arith.constant 0 : i32
    return %arg0, %c0_i32 : i32, i32
  }
  func.func @transform_1(%arg0: i32) -> (i32, i32) {
    %c0_i32 = arith.constant 0 : i32
    %c0_i32_0 = arith.constant 0 : i32
    %c0_i32_1 = arith.constant 0 : i32
    return %c0_i32, %c0_i32_0 : i32, i32
  }
  func.func @transform_2(%arg0: i32) -> (i32, i32) {
    %c0_i32 = arith.constant 0 : i32
    %c0_i32_0 = arith.constant 0 : i32
    %c0_i32_1 = arith.constant 0 : i32
    return %c0_i32, %c0_i32_0 : i32, i32
  }
  func.func @transform_3(%arg0: i32) -> (i32, i32) {
    %c0_i32 = arith.constant 0 : i32
    %c0_i32_0 = arith.constant 0 : i32
    %c0_i32_1 = arith.constant 0 : i32
    return %c0_i32, %c0_i32_0 : i32, i32
  }
  func.func @transform_4(%arg0: i32) -> (i32, i32) {
    %c0_i32 = arith.constant 0 : i32
    %c0_i32_0 = arith.constant 0 : i32
    %c0_i32_1 = arith.constant 0 : i32
    return %c0_i32, %c0_i32_0 : i32, i32
  }
  func.func @transform_5(%arg0: i32) -> (i32, i32) {
    %c0_i32 = arith.constant 0 : i32
    %c0_i32_0 = arith.constant 0 : i32
    %c0_i32_1 = arith.constant 0 : i32
    return %c0_i32, %c0_i32_0 : i32, i32
  }
  func.func @transform_6(%arg0: i32) -> (i32, i32) {
    %c0_i32 = arith.constant 0 : i32
    %c0_i32_0 = arith.constant 0 : i32
    %c0_i32_1 = arith.constant 0 : i32
    return %c0_i32, %c0_i32_0 : i32, i32
  }
  func.func @transform_7(%arg0: i32) -> (i32, i32) {
    %c0_i32 = arith.constant 0 : i32
    %c0_i32_0 = arith.constant 0 : i32
    return %arg0, %c0_i32 : i32, i32
  }
}

module attributes {stable_mosaic.version = 11 : i64} {
  func.func @mlp_kernel(%arg0: i32, %arg1: memref<8x784xf32, #tpu.memory_space<vmem>>, %arg2: memref<784x128xbf16, #tpu.memory_space<vmem>>, %arg3: memref<1x128xf32, #tpu.memory_space<vmem>>, %arg4: memref<128x128xbf16, #tpu.memory_space<vmem>>, %arg5: memref<1x128xf32, #tpu.memory_space<vmem>>, %arg6: memref<128x128xbf16, #tpu.memory_space<vmem>>, %arg7: memref<1x128xf32, #tpu.memory_space<vmem>>, %arg8: memref<8x128xf32, #tpu.memory_space<vmem>>) attributes {dimension_semantics = [#tpu.dimension_semantics<parallel>], iteration_bounds = array<i64: 1>, scalar_prefetch = 0 : i64, scratch_operands = 0 : i64, tpu.core_type = #tpu.core_type<tc>, window_params = [{transform_indices = @transform_0, window_bounds = array<i64: 8, 784>}, {pipeline_mode = #tpu.pipeline_mode<synchronous>, transform_indices = @transform_1, window_bounds = array<i64: 784, 128>}, {pipeline_mode = #tpu.pipeline_mode<synchronous>, transform_indices = @transform_2, window_bounds = array<i64: 1, 128>}, {pipeline_mode = #tpu.pipeline_mode<synchronous>, transform_indices = @transform_3, window_bounds = array<i64: 128, 128>}, {pipeline_mode = #tpu.pipeline_mode<synchronous>, transform_indices = @transform_4, window_bounds = array<i64: 1, 128>}, {pipeline_mode = #tpu.pipeline_mode<synchronous>, transform_indices = @transform_5, window_bounds = array<i64: 128, 128>}, {pipeline_mode = #tpu.pipeline_mode<synchronous>, transform_indices = @transform_6, window_bounds = array<i64: 1, 128>}, {transform_indices = @transform_7, window_bounds = array<i64: 8, 128>}]} {
    %c0 = arith.constant 0 : index
    %c0_0 = arith.constant 0 : index
    %0 = vector.load %arg1[%c0, %c0_0] : memref<8x784xf32, #tpu.memory_space<vmem>>, vector<8x784xf32>
    %1 = arith.truncf %0 : vector<8x784xf32> to vector<8x784xbf16>
    %c0_1 = arith.constant 0 : index
    %c0_2 = arith.constant 0 : index
    %2 = vector.load %arg2[%c0_1, %c0_2] : memref<784x128xbf16, #tpu.memory_space<vmem>>, vector<784x128xbf16>
    %cst = arith.constant dense<0.000000e+00> : vector<8x128xf32>
    %3 = tpu.matmul %1, %2, %cst {dimension_numbers = #tpu.dot_dimension_numbers<[1], [0], [0], [1], [0, 0, 1, 1], [], []>} : vector<8x784xbf16>, vector<784x128xbf16>, vector<8x128xf32> -> vector<8x128xf32>
    %c0_3 = arith.constant 0 : index
    %c0_4 = arith.constant 0 : index
    %4 = vector.load %arg3[%c0_3, %c0_4] : memref<1x128xf32, #tpu.memory_space<vmem>>, vector<1x128xf32>
    %5 = vector.broadcast %4 : vector<1x128xf32> to vector<8x128xf32>
    %6 = arith.addf %3, %5 : vector<8x128xf32>
    %cst_5 = arith.constant 0.000000e+00 : f32
    %7 = vector.broadcast %cst_5 : f32 to vector<8x128xf32>
    %8 = arith.maximumf %6, %7 : vector<8x128xf32>
    %9 = arith.truncf %8 : vector<8x128xf32> to vector<8x128xbf16>
    %c0_6 = arith.constant 0 : index
    %c0_7 = arith.constant 0 : index
    %10 = vector.load %arg4[%c0_6, %c0_7] : memref<128x128xbf16, #tpu.memory_space<vmem>>, vector<128x128xbf16>
    %cst_8 = arith.constant dense<0.000000e+00> : vector<8x128xf32>
    %11 = tpu.matmul %9, %10, %cst_8 {dimension_numbers = #tpu.dot_dimension_numbers<[1], [0], [0], [1], [0, 0, 1, 1], [], []>} : vector<8x128xbf16>, vector<128x128xbf16>, vector<8x128xf32> -> vector<8x128xf32>
    %c0_9 = arith.constant 0 : index
    %c0_10 = arith.constant 0 : index
    %12 = vector.load %arg5[%c0_9, %c0_10] : memref<1x128xf32, #tpu.memory_space<vmem>>, vector<1x128xf32>
    %13 = vector.broadcast %12 : vector<1x128xf32> to vector<8x128xf32>
    %14 = arith.addf %11, %13 : vector<8x128xf32>
    %cst_11 = arith.constant 0.000000e+00 : f32
    %15 = vector.broadcast %cst_11 : f32 to vector<8x128xf32>
    %16 = arith.maximumf %14, %15 : vector<8x128xf32>
    %17 = arith.truncf %16 : vector<8x128xf32> to vector<8x128xbf16>
    %c0_12 = arith.constant 0 : index
    %c0_13 = arith.constant 0 : index
    %18 = vector.load %arg6[%c0_12, %c0_13] : memref<128x128xbf16, #tpu.memory_space<vmem>>, vector<128x128xbf16>
    %cst_14 = arith.constant dense<0.000000e+00> : vector<8x128xf32>
    %19 = tpu.matmul %17, %18, %cst_14 {dimension_numbers = #tpu.dot_dimension_numbers<[1], [0], [0], [1], [0, 0, 1, 1], [], []>} : vector<8x128xbf16>, vector<128x128xbf16>, vector<8x128xf32> -> vector<8x128xf32>
    %c0_15 = arith.constant 0 : index
    %c0_16 = arith.constant 0 : index
    %20 = vector.load %arg7[%c0_15, %c0_16] : memref<1x128xf32, #tpu.memory_space<vmem>>, vector<1x128xf32>
    %21 = vector.broadcast %20 : vector<1x128xf32> to vector<8x128xf32>
    %22 = arith.addf %19, %21 : vector<8x128xf32>
    %c0_17 = arith.constant 0 : index
    %c0_18 = arith.constant 0 : index
    %23 = vector.load %arg8[%c0_17, %c0_18] : memref<8x128xf32, #tpu.memory_space<vmem>>, vector<8x128xf32>
    tpu.vector_store %arg8[%c0_17, %c0_18], %22 {strides = array<i32>} : memref<8x128xf32, #tpu.memory_space<vmem>>, vector<8x128xf32>,
    return
  }
  func.func @transform_0(%arg0: i32) -> (i32, i32) {
    %c0_i32 = arith.constant 0 : i32
    %c0_i32_0 = arith.constant 0 : i32
    return %arg0, %c0_i32 : i32, i32
  }
  func.func @transform_1(%arg0: i32) -> (i32, i32) {
    %c0_i32 = arith.constant 0 : i32
    %c0_i32_0 = arith.constant 0 : i32
    %c0_i32_1 = arith.constant 0 : i32
    return %c0_i32, %c0_i32_0 : i32, i32
  }
  func.func @transform_2(%arg0: i32) -> (i32, i32) {
    %c0_i32 = arith.constant 0 : i32
    %c0_i32_0 = arith.constant 0 : i32
    %c0_i32_1 = arith.constant 0 : i32
    return %c0_i32, %c0_i32_0 : i32, i32
  }
  func.func @transform_3(%arg0: i32) -> (i32, i32) {
    %c0_i32 = arith.constant 0 : i32
    %c0_i32_0 = arith.constant 0 : i32
    %c0_i32_1 = arith.constant 0 : i32
    return %c0_i32, %c0_i32_0 : i32, i32
  }
  func.func @transform_4(%arg0: i32) -> (i32, i32) {
    %c0_i32 = arith.constant 0 : i32
    %c0_i32_0 = arith.constant 0 : i32
    %c0_i32_1 = arith.constant 0 : i32
    return %c0_i32, %c0_i32_0 : i32, i32
  }
  func.func @transform_5(%arg0: i32) -> (i32, i32) {
    %c0_i32 = arith.constant 0 : i32
    %c0_i32_0 = arith.constant 0 : i32
    %c0_i32_1 = arith.constant 0 : i32
    return %c0_i32, %c0_i32_0 : i32, i32
  }
  func.func @transform_6(%arg0: i32) -> (i32, i32) {
    %c0_i32 = arith.constant 0 : i32
    %c0_i32_0 = arith.constant 0 : i32
    %c0_i32_1 = arith.constant 0 : i32
    return %c0_i32, %c0_i32_0 : i32, i32
  }
  func.func @transform_7(%arg0: i32) -> (i32, i32) {
    %c0_i32 = arith.constant 0 : i32
    %c0_i32_0 = arith.constant 0 : i32
    return %arg0, %c0_i32 : i32, i32
  }
}

</mosaic_0001>

<bundles_post_ra>
// kernel: tpu_custom_call.1
= control target key start
LH: loop header
LB: loop body
LE: loop exit
PB: predicated region body
PF: predicated region fallthrough
CT: control target
= control target key end

     0   :  { %12 = vsyncpa [#allocation3], 0  ;;  %s1445_s0 = inlined_call_operand.hbm [shape: f32[8,784], index: 0, kind: input, shape index: {}]   ;;  %s1446_s1 = inlined_call_operand.hbm [shape: bf16[784,128], index: 1, kind: input, shape index: {}]   ;;  %s1447_s2 = inlined_call_operand.vmem [shape: f32[1,128], index: 2, kind: input, shape index: {}]   ;;  %s1448_s3 = inlined_call_operand.hbm [shape: bf16[128,128], index: 3, kind: input, shape index: {}]   ;;  %s1449_s4 = inlined_call_operand.vmem [shape: f32[1,128], index: 4, kind: input, shape index: {}]   ;;  %s1450_s5 = inlined_call_operand.hbm [shape: bf16[128,128], index: 5, kind: input, shape index: {}]   ;;  %s1451_s6 = inlined_call_operand.vmem [shape: f32[1,128], index: 6, kind: input, shape index: {}]   ;;  %s1452_s7 = inlined_call_operand.hbm [shape: f32[8,128], index: 7, kind: output, shape index: {}]  }
   0x1   :  { %13 = vsyncpa [#allocation6], 0 }
   0x2   :  { %14 = vsyncpa [#allocation9], 0 }
   0x3   :  { %15 = vsyncpa [#allocation4], 0  ;;  %s1295_s24 = smov [#allocation5]   ;;  %s1177_s28 = scalar_lea.hbm %s1446_s1, 6272 }
   0x4   :  { %s31_s25 = sshll.u32 %s1295_s24, 4  ;;  %p1178_p0 = scmp.ne.s32.totalorder %s1446_s1, %s1177_s28  ;;  %s32_s25 = int_to_ptr.vmem [resolvable:$true] %s31_s25 }
   0x5   :  { %p1181_p1 = scmp.lt.u32.totalorder %s1177_s28, %s1446_s1 }
   0x7   :  { %p1183_p2 = pnand %p1181_p1, %p1178_p0 }
   0x9   :  { %1186 = shalt.err (!%p1183_p2)
}
   0xa   :  { %s1187_s10 = scalar_lea.vmem %s32_s25, 6272  ;;  %p1192_p4 = scmp.lt.s32.totalorder %s32_s25, %s32_s25 }
   0xb   :  { %p1188_p3 = scmp.ne.s32.totalorder %s32_s25, %s1187_s10  ;;  %p1193_p5 = scmp.lt.s32.totalorder %s1187_s10, %s1187_s10 }
   0xd   :  { %p1194_p6 = por %p1193_p5, %p1192_p4 }
   0xf   :  { %p1195_p7 = pnand %p1194_p6, %p1188_p3 }
  0x11   :  { %1198 = shalt.err (!%p1195_p7)
}
  0x12   :  { %s1296_s11 = smov 64   ;;  %s1297_s12 = smov 4  }
  0x13   :  { %37 = dma.hbm_to_vmem [thread:$0]  %s1446_s1, 6272, %s32_s25, [#allocation6], %s1296_s11, %s1296_s11, %s1297_s12  }
  0x14   :  { %s1298_s15 = smov [#allocation2]   ;;  %s1299_s17 = smov [#allocation7]  }
  0x15   :  { %s22_s16 = sshll.u32 %s1298_s15, 4  ;;  %s45_s18 = sshll.u32 %s1299_s17, 4  ;;  %s23_s16 = int_to_ptr.vmem [resolvable:$true] %s22_s16  ;;  %s46_s18 = int_to_ptr.vmem [resolvable:$true] %s45_s18 }
  0x16   :  { %s1199_s21 = scalar_lea.hbm %s1445_s0, 896 }
  0x17   :  { %p1200_p8 = scmp.ne.s32.totalorder %s1445_s0, %s1199_s21  ;;  %p1203_p9 = scmp.lt.u32.totalorder %s1199_s21, %s1445_s0 }
  0x19   :  { %p1205_p10 = pnand %p1203_p9, %p1200_p8 }
  0x1b   :  { %1208 = shalt.err (!%p1205_p10)
}
  0x1c   :  { %s1209_s1 = scalar_lea.vmem %s23_s16, 896  ;;  %p1214_p12 = scmp.lt.s32.totalorder %s23_s16, %s23_s16 }
  0x1d   :  { %p1210_p11 = scmp.ne.s32.totalorder %s23_s16, %s1209_s1  ;;  %p1215_p13 = scmp.lt.s32.totalorder %s1209_s1, %s1209_s1 }
  0x1f   :  { %p1216_p0 = por %p1215_p13, %p1214_p12 }
  0x21   :  { %p1217_p1 = pnand %p1216_p0, %p1210_p11 }
  0x23   :  { %1220 = shalt.err (!%p1217_p1)
}
  0x24   :  { %25 = dma.hbm_to_vmem [thread:$0]  %s1445_s0, 896, %s23_s16, [#allocation3]  }
  0x25   :  { %s1221_s30 = scalar_lea.hbm %s1448_s3, 1024 }
  0x26   :  { %p1222_p2 = scmp.ne.s32.totalorder %s1448_s3, %s1221_s30  ;;  %p1225_p3 = scmp.lt.u32.totalorder %s1221_s30, %s1448_s3 }
  0x28   :  { %p1227_p4 = pnand %p1225_p3, %p1222_p2 }
  0x2a   :  { %1230 = shalt.err (!%p1227_p4)
}
  0x2b   :  { %s1231_s14 = scalar_lea.vmem %s46_s18, 1024  ;;  %p1236_p6 = scmp.lt.s32.totalorder %s46_s18, %s46_s18 }
  0x2c   :  { %p1232_p5 = scmp.ne.s32.totalorder %s46_s18, %s1231_s14  ;;  %p1237_p7 = scmp.lt.s32.totalorder %s1231_s14, %s1231_s14 }
  0x2e   :  { %p1238_p8 = por %p1237_p7, %p1236_p6 }
  0x30   :  { %p1239_p9 = pnand %p1238_p8, %p1232_p5 }
  0x32   :  { %1242 = shalt.err (!%p1239_p9)
}
  0x33   :  { %51 = dma.hbm_to_vmem [thread:$0]  %s1448_s3, 1024, %s46_s18, [#allocation6], %s1296_s11, %s1296_s11, %s1297_s12  }
  0x34   :  { %s1300_s16 = smov [#allocation8]   ;;  %s1243_s21 = scalar_lea.hbm %s1450_s5, 1024 }
  0x35   :  { %s59_s17 = sshll.u32 %s1300_s16, 4  ;;  %p1244_p10 = scmp.ne.s32.totalorder %s1450_s5, %s1243_s21  ;;  %s60_s17 = int_to_ptr.vmem [resolvable:$true] %s59_s17 }
  0x36   :  { %p1247_p11 = scmp.lt.u32.totalorder %s1243_s21, %s1450_s5 }
  0x38   :  { %p1249_p12 = pnand %p1247_p11, %p1244_p10 }
  0x3a   :  { %1252 = shalt.err (!%p1249_p12)
}
  0x3b   :  { %s1253_s1 = scalar_lea.vmem %s60_s17, 1024  ;;  %p1258_p0 = scmp.lt.s32.totalorder %s60_s17, %s60_s17 }
  0x3c   :  { %p1254_p13 = scmp.ne.s32.totalorder %s60_s17, %s1253_s1  ;;  %p1259_p1 = scmp.lt.s32.totalorder %s1253_s1, %s1253_s1 }
  0x3e   :  { %p1260_p2 = por %p1259_p1, %p1258_p0 }
  0x40   :  { %p1261_p3 = pnand %p1260_p2, %p1254_p13 }
  0x42   :  { %1264 = shalt.err (!%p1261_p3)
}
  0x43   :  { %65 = dma.hbm_to_vmem [thread:$0]  %s1450_s5, 1024, %s60_s17, [#allocation9], %s1296_s11, %s1296_s11, %s1297_s12  }
  0x44   :  { %1287 = dma.done.wait [#allocation3], 896  }
  0x45   :  { %1288 = vsyncadd [#allocation3], 4294966400 }
  0x46   :  { %1289 = dma.done.wait [#allocation6], 7296  }
  0x47   :  { %1290 = vsyncadd [#allocation6], 4294960000 }
  0x48   :  { %1291 = dma.done.wait [#allocation9], 1024  }
  0x49   :  { %1292 = vsyncadd [#allocation9], 4294966272  ;;  %v1112_v0 = vld [vmem:[#allocation5 + $0x40] sm:$0xff]   ;;  %v1116_v4 = vld [vmem:[#allocation5 + $0x48] sm:$0xff]   ;;  %v1301_v44 = vmov 0.0   ;;  %vm1302_vm0 = vmmov 0  }
  0x4a   :  { %v1113_v1 = vld [vmem:[#allocation5] sm:$0xff]   ;;  %971 = vmatprep.subr.bf16.mxu0 %v1112_v0  ;;  %v1117_v5 = vld [vmem:[#allocation5 + $0x8] sm:$0xff]   ;;  %v1120_v8 = vld [vmem:[#allocation5 + $0x50] sm:$0xff]   ;;  %vm494_vm1 = vcmask 130048   ;;  %s1303_s28 = smov [#allocation10]  }
  0x4b   :  { %v1114_v2 = vld [vmem:[#allocation5 + $0xc0] sm:$0xff]   ;;  %972 = vmatpush3.bf16.msra.mxu0 %v1113_v1  ;;  %v1118_v6 = vld [vmem:[#allocation5 + $0xc8] sm:$0xff]   ;;  %v1121_v9 = vld [vmem:[#allocation5 + $0x10] sm:$0xff]   ;;  %s891_s29 = sshll.u32 %s1303_s28, 4  ;;  %s892_s29 = int_to_ptr.vmem [resolvable:$true] %s891_s29 }
  0x4c   :  { %v1115_v3 = vld [vmem:[#allocation5 + $0x80] sm:$0xff]   ;;  %993 = vmatprep.subr.bf16.mxu1 %v1114_v2  ;;  %973 = vmatprep.subr.bf16.mxu0 %v1116_v4  ;;  %v1119_v7 = vld [vmem:[#allocation5 + $0x88] sm:$0xff]   ;;  %v1122_v10 = vld [vmem:[#allocation5 + $0xd0] sm:$0xff]   ;;  %p1270_p5 = scmp.lt.s32.totalorder %s892_s29, %s892_s29 }
  0x4d   :  { %994 = vmatpush3.bf16.msra.mxu1 %v1115_v3  ;;  %v1123_v11 = vld [vmem:[#allocation5 + $0x90] sm:$0xff]   ;;  %v1124_v12 = vld [vmem:[#allocation5 + $0x58] sm:$0xff]   ;;  %v1128_v16 = vld [vmem:[#allocation5 + $0x60] sm:$0xff]  }
  0x4e   :  { %995 = vmatprep.subr.bf16.mxu1 %v1118_v6  ;;  %v1125_v13 = vld [vmem:[#allocation5 + $0x18] sm:$0xff]   ;;  %v1129_v17 = vld [vmem:[#allocation5 + $0x20] sm:$0xff]   ;;  %v1132_v20 = vld [vmem:[#allocation5 + $0x68] sm:$0xff]  }
  0x4f   :  { %974 = vmatpush3.bf16.msra.mxu0 %v1117_v5  ;;  %v1126_v14 = vld [vmem:[#allocation5 + $0xd8] sm:$0xff]   ;;  %v1130_v18 = vld [vmem:[#allocation5 + $0xe0] sm:$0xff]   ;;  %v1133_v21 = vld [vmem:[#allocation5 + $0x28] sm:$0xff]  }
  0x50   :  { %975 = vmatprep.subr.bf16.mxu0 %v1120_v8  ;;  %v1127_v15 = vld [vmem:[#allocation5 + $0x98] sm:$0xff]   ;;  %v1131_v19 = vld [vmem:[#allocation5 + $0xa0] sm:$0xff]   ;;  %v1134_v22 = vld [vmem:[#allocation5 + $0xe8] sm:$0xff]  }
  0x51   :  { %996 = vmatpush3.bf16.msra.mxu1 %v1119_v7  ;;  %v1135_v23 = vld [vmem:[#allocation5 + $0xa8] sm:$0xff]   ;;  %v1136_v24 = vld [vmem:[#allocation5 + $0x70] sm:$0xff]   ;;  %v1140_v28 = vld [vmem:[#allocation5 + $0x78] sm:$0xff]  }
  0x52   :  { %997 = vmatprep.subr.bf16.mxu1 %v1122_v10  ;;  %v1137_v25 = vld [vmem:[#allocation5 + $0x30] sm:$0xff]   ;;  %v1141_v29 = vld [vmem:[#allocation5 + $0x38] sm:$0xff]   ;;  %v81_v34 = vld [vmem:[#allocation2] sm:$0xff] }
  0x53   :  { %976 = vmatpush3.bf16.msra.mxu0 %v1121_v9  ;;  %v1138_v26 = vld [vmem:[#allocation5 + $0xf0] sm:$0xff]   ;;  %v1142_v30 = vld [vmem:[#allocation5 + $0xf8] sm:$0xff]   ;;  %v88_v35 = vpack.c.bf16 %v81_v34, %v81_v34  ;;  %v1144_v36 = vld [vmem:[#allocation5 + $0x140] sm:$0xff]  }
  0x54   :  { %977 = vmatprep.subr.bf16.mxu0 %v1124_v12  ;;  %v1139_v27 = vld [vmem:[#allocation5 + $0xb0] sm:$0xff]   ;;  %v1143_v33 = vld [vmem:[#allocation5 + $0xb8] sm:$0xff]   ;;  %v84_v37 = vld [vmem:[#allocation2 + $0x18] sm:$0xff] }
  0x55   :  { %998 = vmatpush3.bf16.msra.mxu1 %v1123_v11  ;;  %v82_v31 = vld [vmem:[#allocation2 + $0x8] sm:$0xff]  ;;  %v91_v38 = vpack.c.bf16 %v84_v37, %v84_v37  ;;  %v1145_v39 = vld [vmem:[#allocation5 + $0x100] sm:$0xff]   ;;  %v83_v40 = vld [vmem:[#allocation2 + $0x10] sm:$0xff] }
  0x56   :  { %999 = vmatprep.subr.bf16.mxu1 %v1126_v14  ;;  %v89_v32 = vpack.c.bf16 %v82_v31, %v82_v31  ;;  %v90_v41 = vpack.c.bf16 %v83_v40, %v83_v40  ;;  %v1146_v42 = vld [vmem:[#allocation5 + $0x148] sm:$0xff]   ;;  %v1148_v45 = vld [vmem:[#allocation5 + $0x150] sm:$0xff]   ;;  %v1150_v47 = vld [vmem:[#allocation5 + $0x158] sm:$0xff]  }
  0x57   :  { %978 = vmatpush3.bf16.msra.mxu0 %v1125_v13  ;;  %570 = vmatprep.mubr.bf16.mxu1 %v91_v38  ;;  %v1147_v43 = vld [vmem:[#allocation5 + $0x108] sm:$0xff]   ;;  %v1149_v46 = vld [vmem:[#allocation5 + $0x110] sm:$0xff]   ;;  %v1151_v48 = vld [vmem:[#allocation5 + $0x118] sm:$0xff]  }
  0x58   :  { %979 = vmatprep.subr.bf16.mxu0 %v1128_v16  ;;  %530 = vmatprep.mubr.bf16.mxu0 %v89_v32  ;;  %v1152_v49 = vld [vmem:[#allocation5 + $0x160] sm:$0xff]   ;;  %v1154_v51 = vld [vmem:[#allocation5 + $0x168] sm:$0xff]   ;;  %v86_v54 = vld [vmem:[#allocation2 + $0x28] sm:$0xff] }
  0x59   :  { %1000 = vmatpush3.bf16.msra.mxu1 %v1127_v15  ;;  %v1153_v50 = vld [vmem:[#allocation5 + $0x120] sm:$0xff]   ;;  %v1155_v52 = vld [vmem:[#allocation5 + $0x128] sm:$0xff]   ;;  %v1156_v55 = vld [vmem:[#allocation5 + $0x170] sm:$0xff]   ;;  %v93_v56 = vpack.c.bf16 %v86_v54, %v86_v54 }
  0x5a   :  { %1001 = vmatprep.subr.bf16.mxu1 %v1130_v18  ;;  %v1160_v53 = vld [vmem:[#allocation5 + $0x180] sm:$0xff]   ;;  %v87_v57 = vld [vmem:[#allocation2 + $0x30] sm:$0xff]  ;;  %v1157_v59 = vld [vmem:[#allocation5 + $0x130] sm:$0xff]  }
  0x5b   :  { %980 = vmatpush3.bf16.msra.mxu0 %v1129_v17  ;;  %v94_v58 = vpack.c.bf16 %v87_v57, %v87_v57  ;;  %v1158_v60 = vld [vmem:[#allocation5 + $0x178] sm:$0xff]   ;;  %v85_v62 = vld [vmem:[#allocation2 + $0x20] sm:$0xff]  ;;  %v1162_v1 = vld [vmem:[#allocation7 + $0x8] sm:$0xff]  }
  0x5c   :  { %981 = vmatprep.subr.bf16.mxu0 %v1132_v20  ;;  %v1159_v61 = vld [vmem:[#allocation5 + $0x138] sm:$0xff]   ;;  %v92_v63 = vpack.c.bf16 %v85_v62, %v85_v62  ;;  %v1161_v0 = vld [vmem:[#allocation7] sm:$0xff]   ;;  %v1164_v3 = vld [vmem:[#allocation7 + $0x18] sm:$0xff]  }
  0x5d   :  { %1002 = vmatpush3.bf16.msra.mxu1 %v1131_v19  ;;  %v1163_v2 = vld [vmem:[#allocation7 + $0x10] sm:$0xff]   ;;  %v1165_v4 = vld [vmem:[#allocation7 + $0x20] sm:$0xff]   ;;  %v1166_v5 = vld [vmem:[#allocation7 + $0x28] sm:$0xff]  }
  0x5e   :  { %1003 = vmatprep.subr.bf16.mxu1 %v1134_v22  ;;  %v1167_v6 = vld [vmem:[#allocation7 + $0x30] sm:$0xff]   ;;  %v1168_v7 = vld [vmem:[#allocation7 + $0x38] sm:$0xff]   ;;  %v1169_v8 = vld [vmem:[#allocation8] sm:$0xff]  }
  0x5f   :  { %982 = vmatpush3.bf16.msra.mxu0 %v1133_v21  ;;  %v1170_v9 = vld [vmem:[#allocation8 + $0x8] sm:$0xff]   ;;  %v1171_v10 = vld [vmem:[#allocation8 + $0x10] sm:$0xff]   ;;  %v1172_v11 = vld [vmem:[#allocation8 + $0x18] sm:$0xff]  }
  0x60   :  { %983 = vmatprep.subr.bf16.mxu0 %v1136_v24  ;;  %v1173_v12 = vld [vmem:[#allocation8 + $0x20] sm:$0xff]   ;;  %v1174_v13 = vld [vmem:[#allocation8 + $0x28] sm:$0xff]   ;;  %v1175_v40 = vld [vmem:[#allocation8 + $0x30] sm:$0xff]  }
  0x61   :  { %1004 = vmatpush3.bf16.msra.mxu1 %v1135_v23  ;;  %v902_v15 = vld [vmem:[%s1447_s2] ss:$0 sm:$0xff] }
  0x62   :  { %1005 = vmatprep.subr.bf16.mxu1 %v1138_v26 }
  0x63   :  { %984 = vmatpush3.bf16.msra.mxu0 %v1137_v25 }
  0x64   :  { %985 = vmatprep.subr.bf16.mxu0 %v1140_v28 }
  0x65   :  { %1006 = vmatpush3.bf16.msra.mxu1 %v1139_v27 }
  0x66   :  { %1007 = vmatprep.subr.bf16.mxu1 %v1142_v30 }
  0x67   :  { %986 = vmatpush3.bf16.msra.mxu0 %v1141_v29 }
  0x68   :  { %1015 = vmatprep.subr.bf16.mxu0 %v1144_v36 }
  0x69   :  { %1008 = vmatpush3.bf16.msra.mxu1 %v1143_v33 }
  0x6a   :  { %531 = vmatmul.mubr.bf16.vlgmr.msra.gmra.mrb[0].mxu0 %v88_v35  ;;  %1057 = vmatprep.subr.bf16.mxu1 %v1301_v44 }
  0x6b   :  { %1016 = vmatpush3.bf16.msra.mxu0 %v1145_v39  ;;  %610 = vmatprep.mubr.bf16.mxu0 %v93_v56 }
  0x6c   :  { %571 = vmatmul.mubr.bf16.vlgmr.msra.gmra.mrb[0].mxu1 %v90_v41  ;;  %1017 = vmatprep.subr.bf16.mxu0 %v1146_v42  ;;  %v1176_v41 = vld [vmem:[#allocation8 + $0x38] sm:$0xff]   ;;  %v953_v42 = vld [vmem:[%s1449_s4] ss:$0 sm:$0xff]  ;;  %s1265_s4 = scalar_lea.vmem %s892_s29, 128 }
  0x6d   :  { %1059 = vmatprep.mubr.msk.bf16.mxu1 %vm1302_vm0, %v1301_v44  ;;  %1058 = vmatpush3.bf16.msra.mxu1 %v1160_v53  ;;  %p1266_p4 = scmp.ne.s32.totalorder %s892_s29, %s1265_s4  ;;  %p1271_p6 = scmp.lt.s32.totalorder %s1265_s4, %s1265_s4 }
  0x6e   :  { %1063 = vmatprep.subr.bf16.mxu1 %v1301_v44 }
  0x6f   :  { %1018 = vmatpush3.bf16.msra.mxu0 %v1147_v43  ;;  %p1272_p7 = por %p1271_p6, %p1270_p5 }
  0x70   :  { %1019 = vmatprep.subr.bf16.mxu0 %v1148_v45 }
  0x71   :  { %p1273_p8 = pnand %p1272_p7, %p1266_p4 }
  0x73   :  { %1020 = vmatpush3.bf16.msra.mxu0 %v1149_v46 }
  0x74   :  { %1021 = vmatprep.subr.bf16.mxu0 %v1150_v47  ;;  %1060 = vmatmul.mubr.msk.bf16.vlgmr.msra.gmra.mrb[4].mxu1 %vm494_vm1, %v94_v58 }
  0x75   :  { %1079 = vmatprep.mubr.msk.bf16.mxu1 %vm1302_vm0, %v1301_v44  ;;  %1064 = vmatpush3.bf16.msra.mxu1 %v1161_v0 }
  0x76   :  { %1065 = vmatprep.subr.bf16.mxu1 %v1301_v44 }
  0x77   :  { %1022 = vmatpush3.bf16.msra.mxu0 %v1151_v48 }
  0x78   :  { %1023 = vmatprep.subr.bf16.mxu0 %v1152_v49 }
  0x79   :  { %1066 = vmatpush3.bf16.msra.mxu1 %v1162_v1 }
  0x7a   :  { %1067 = vmatprep.subr.bf16.mxu1 %v1301_v44 }
  0x7b   :  { %1024 = vmatpush3.bf16.msra.mxu0 %v1153_v50 }
  0x7c   :  { %1025 = vmatprep.subr.bf16.mxu0 %v1154_v51  ;;  %v962_v51 = vld [vmem:[%s1451_s6] ss:$0 sm:$0xff] }
  0x7d   :  { %1068 = vmatpush3.bf16.msra.mxu1 %v1163_v2 }
  0x7e   :  { %1069 = vmatprep.subr.bf16.mxu1 %v1301_v44 }
  0x7f   :  { %1026 = vmatpush3.bf16.msra.mxu0 %v1155_v52 }
  0x80   :  { %1027 = vmatprep.subr.bf16.mxu0 %v1156_v55 }
  0x81   :  { %1070 = vmatpush3.bf16.msra.mxu1 %v1164_v3 }
  0x82   :  { %1071 = vmatprep.subr.bf16.mxu1 %v1301_v44 }
  0x83   :  { %1028 = vmatpush3.bf16.msra.mxu0 %v1157_v59 }
  0x84   :  { %1029 = vmatprep.subr.bf16.mxu0 %v1158_v60 }
  0x85   :  { %1072 = vmatpush3.bf16.msra.mxu1 %v1165_v4 }
  0x86   :  { %1073 = vmatprep.subr.bf16.mxu1 %v1301_v44 }
  0x87   :  { %1030 = vmatpush3.bf16.msra.mxu0 %v1159_v61 }
  0x88   :  { %1083 = vmatprep.subr.bf16.mxu0 %v1301_v44 }
  0x89   :  { %1074 = vmatpush3.bf16.msra.mxu1 %v1166_v5 }
  0x8a   :  { %611 = vmatmul.mubr.bf16.vlgmr.msra.gmra.mrb[4].mxu0 %v92_v63  ;;  %1075 = vmatprep.subr.bf16.mxu1 %v1301_v44 }
  0x8b   :  { %1099 = vmatprep.mubr.msk.bf16.mxu0 %vm1302_vm0, %v1301_v44  ;;  %1084 = vmatpush3.bf16.msra.mxu0 %v1169_v8 }
  0x8c   :  { %1085 = vmatprep.subr.bf16.mxu0 %v1301_v44 }
  0x8d   :  { %1076 = vmatpush3.bf16.msra.mxu1 %v1167_v6 }
  0x8e   :  { %1077 = vmatprep.subr.bf16.mxu1 %v1301_v44 }
  0x8f   :  { %1086 = vmatpush3.bf16.msra.mxu0 %v1170_v9 }
  0x90   :  { %1087 = vmatprep.subr.bf16.mxu0 %v1301_v44 }
  0x91   :  { %1078 = vmatpush3.bf16.msra.mxu1 %v1168_v7 }
  0x93   :  { %1088 = vmatpush3.bf16.msra.mxu0 %v1171_v10 }
  0x94   :  { %1089 = vmatprep.subr.bf16.mxu0 %v1301_v44 }
  0x97   :  { %1090 = vmatpush3.bf16.msra.mxu0 %v1172_v11 }
  0x98   :  { %1091 = vmatprep.subr.bf16.mxu0 %v1301_v44 }
  0x9b   :  { %1092 = vmatpush3.bf16.msra.mxu0 %v1173_v12 }
  0x9c   :  { %1093 = vmatprep.subr.bf16.mxu0 %v1301_v44 }
  0x9f   :  { %1094 = vmatpush3.bf16.msra.mxu0 %v1174_v13 }
  0xa0   :  { %1095 = vmatprep.subr.bf16.mxu0 %v1301_v44 }
  0xa3   :  { %1096 = vmatpush3.bf16.msra.mxu0 %v1175_v40 }
  0xa4   :  { %1097 = vmatprep.subr.bf16.mxu0 %v1301_v44 }
  0xa7   :  { %1098 = vmatpush3.bf16.msra.mxu0 %v1176_v41 }
 0x13d   :  { %v987_v14 = vpop.f32.mrb[0].mxu0 }
 0x13e   :  { %v988_v16 = vpop.f32.mrb[1].mxu0 }
 0x13f   :  { %v989_v17 = vadd.f32 %v988_v16, %v987_v14  ;;  %v990_v18 = vpop.f32.mrb[2].mxu0  ;;  %v1009_v19 = vpop.f32.mrb[0].mxu1 }
 0x140   :  { %v991_v20 = vpop.f32.mrb[3].mxu0  ;;  %v1010_v22 = vpop.f32.mrb[1].mxu1 }
 0x141   :  { %v533_v21 = vadd.f32 %v989_v17, %v902_v15  ;;  %v1011_v23 = vadd.f32 %v1010_v22, %v1009_v19  ;;  %v1012_v24 = vpop.f32.mrb[2].mxu1 }
 0x142   :  { %v1013_v25 = vpop.f32.mrb[3].mxu1 }
 0x143   :  { %v573_v26 = vadd.f32 %v1011_v23, %v533_v21 }
 0x147   :  { %v652_v27 = vpop.f32.mrb[4].mxu1 }
 0x148   :  { %v1061_v28 = vpop.f32.mrb[5].mxu1 }
 0x149   :  { %v655_v29 = vpop.f32.mrb[6].mxu1 }
 0x14a   :  { %v1062_v30 = vpop.f32.mrb[7].mxu1 }
 0x15d   :  { %v1031_v31 = vpop.f32.mrb[4].mxu0 }
 0x15e   :  { %v1032_v32 = vpop.f32.mrb[5].mxu0 }
 0x15f   :  { %v1033_v33 = vadd.f32 %v1032_v32, %v1031_v31  ;;  %v1034_v34 = vpop.f32.mrb[6].mxu0 }
 0x160   :  { %v1035_v35 = vpop.f32.mrb[7].mxu0 }
 0x161   :  { %v613_v36 = vadd.f32 %v1033_v33, %v573_v26 }
 0x163   :  { %v653_v37 = vadd.f32 %v652_v27, %v613_v36 }
 0x165   :  { %v658_v38 = vmax.f32 %v653_v37, 0.0 }
 0x167   :  { %v659_v39 = vpack.c.bf16 %v658_v38, %v658_v38 }
 0x169   :  { %1080 = vmatmul.mubr.bf16.vlgmr.msra.gmra.mrb[8].mxu1 %v659_v39 }
 0x23c   :  { %v765_v43 = vpop.f32.mrb[8].mxu1 }
 0x23d   :  { %v766_v45 = vadd.f32 %v953_v42, %v765_v43  ;;  %v1081_v46 = vpop.f32.mrb[9].mxu1 }
 0x23e   :  { %v768_v47 = vpop.f32.mrb[10].mxu1 }
 0x23f   :  { %v771_v48 = vmax.f32 %v766_v45, 0.0  ;;  %v1082_v49 = vpop.f32.mrb[11].mxu1 }
 0x241   :  { %v772_v50 = vpack.c.bf16 %v771_v48, %v771_v48 }
 0x243   :  { %1100 = vmatmul.mubr.bf16.vlgmr.msra.gmra.mrb[8].mxu0 %v772_v50 }
 0x316   :  { %v878_v44 = vpop.f32.mrb[8].mxu0 }
 0x317   :  { %v879_v52 = vadd.f32 %v962_v51, %v878_v44  ;;  %v1101_v53 = vpop.f32.mrb[9].mxu0 }
 0x318   :  { %v881_v54 = vpop.f32.mrb[10].mxu0 }
 0x319   :  { %884 = vst [vmem:[#allocation10] sm:$0xff] %v879_v52  ;;  %v1102_v55 = vpop.f32.mrb[11].mxu0 }
 0x31a   :  { %1276 = shalt.err (!%p1273_p8)
}
 0x31b   :  { %s1277_s6 = scalar_lea.hbm %s1452_s7, 128 }
 0x31c   :  { %p1278_p9 = scmp.ne.s32.totalorder %s1452_s7, %s1277_s6  ;;  %p1281_p10 = scmp.lt.u32.totalorder %s1277_s6, %s1452_s7 }
 0x31e   :  { %p1283_p11 = pnand %p1281_p10, %p1278_p9 }
 0x320   :  { %1286 = shalt.err (!%p1283_p11)
}
 0x321   :  { %894 = dma.vmem_to_hbm [thread:$0]  %s892_s29, 128, %s1452_s7, [#allocation4]  }
 0x322   :  { %1293 = dma.done.wait [#allocation4], 128  }
 0x323   :  { %1294 = vsyncadd [#allocation4], 4294967168 }
 0x324   :  { %898 = vsyncpa [#allocation3], 1 }
 0x325   :  { %899 = vsyncpa [#allocation6], 1 }
 0x326   :  { %900 = vsyncpa [#allocation9], 1 }
 0x327   :  { %901 = vsyncpa [#allocation4], 1 }

// kernel: tpu_custom_call.1
= control target key start
LH: loop header
LB: loop body
LE: loop exit
PB: predicated region body
PF: predicated region fallthrough
CT: control target
= control target key end

     0   :  { %12 = vsyncpa [#allocation3], 0  ;;  %s1445_s0 = inlined_call_operand.hbm [shape: f32[8,784], index: 0, kind: input, shape index: {}]   ;;  %s1446_s1 = inlined_call_operand.hbm [shape: bf16[784,128], index: 1, kind: input, shape index: {}]   ;;  %s1447_s2 = inlined_call_operand.vmem [shape: f32[1,128], index: 2, kind: input, shape index: {}]   ;;  %s1448_s3 = inlined_call_operand.hbm [shape: bf16[128,128], index: 3, kind: input, shape index: {}]   ;;  %s1449_s4 = inlined_call_operand.vmem [shape: f32[1,128], index: 4, kind: input, shape index: {}]   ;;  %s1450_s5 = inlined_call_operand.hbm [shape: bf16[128,128], index: 5, kind: input, shape index: {}]   ;;  %s1451_s6 = inlined_call_operand.vmem [shape: f32[1,128], index: 6, kind: input, shape index: {}]   ;;  %s1452_s7 = inlined_call_operand.hbm [shape: f32[8,128], index: 7, kind: output, shape index: {}]  }
   0x1   :  { %13 = vsyncpa [#allocation6], 0 }
   0x2   :  { %14 = vsyncpa [#allocation9], 0 }
   0x3   :  { %15 = vsyncpa [#allocation4], 0  ;;  %s1295_s24 = smov [#allocation5]   ;;  %s1177_s28 = scalar_lea.hbm %s1446_s1, 6272 }
   0x4   :  { %s31_s25 = sshll.u32 %s1295_s24, 4  ;;  %p1178_p0 = scmp.ne.s32.totalorder %s1446_s1, %s1177_s28  ;;  %s32_s25 = int_to_ptr.vmem [resolvable:$true] %s31_s25 }
   0x5   :  { %p1181_p1 = scmp.lt.u32.totalorder %s1177_s28, %s1446_s1 }
   0x7   :  { %p1183_p2 = pnand %p1181_p1, %p1178_p0 }
   0x9   :  { %1186 = shalt.err (!%p1183_p2)
}
   0xa   :  { %s1187_s10 = scalar_lea.vmem %s32_s25, 6272  ;;  %p1192_p4 = scmp.lt.s32.totalorder %s32_s25, %s32_s25 }
   0xb   :  { %p1188_p3 = scmp.ne.s32.totalorder %s32_s25, %s1187_s10  ;;  %p1193_p5 = scmp.lt.s32.totalorder %s1187_s10, %s1187_s10 }
   0xd   :  { %p1194_p6 = por %p1193_p5, %p1192_p4 }
   0xf   :  { %p1195_p7 = pnand %p1194_p6, %p1188_p3 }
  0x11   :  { %1198 = shalt.err (!%p1195_p7)
}
  0x12   :  { %s1296_s11 = smov 64   ;;  %s1297_s12 = smov 4  }
  0x13   :  { %37 = dma.hbm_to_vmem [thread:$0]  %s1446_s1, 6272, %s32_s25, [#allocation6], %s1296_s11, %s1296_s11, %s1297_s12  }
  0x14   :  { %s1298_s15 = smov [#allocation2]   ;;  %s1299_s17 = smov [#allocation7]  }
  0x15   :  { %s22_s16 = sshll.u32 %s1298_s15, 4  ;;  %s45_s18 = sshll.u32 %s1299_s17, 4  ;;  %s23_s16 = int_to_ptr.vmem [resolvable:$true] %s22_s16  ;;  %s46_s18 = int_to_ptr.vmem [resolvable:$true] %s45_s18 }
  0x16   :  { %s1199_s21 = scalar_lea.hbm %s1445_s0, 896 }
  0x17   :  { %p1200_p8 = scmp.ne.s32.totalorder %s1445_s0, %s1199_s21  ;;  %p1203_p9 = scmp.lt.u32.totalorder %s1199_s21, %s1445_s0 }
  0x19   :  { %p1205_p10 = pnand %p1203_p9, %p1200_p8 }
  0x1b   :  { %1208 = shalt.err (!%p1205_p10)
}
  0x1c   :  { %s1209_s1 = scalar_lea.vmem %s23_s16, 896  ;;  %p1214_p12 = scmp.lt.s32.totalorder %s23_s16, %s23_s16 }
  0x1d   :  { %p1210_p11 = scmp.ne.s32.totalorder %s23_s16, %s1209_s1  ;;  %p1215_p13 = scmp.lt.s32.totalorder %s1209_s1, %s1209_s1 }
  0x1f   :  { %p1216_p0 = por %p1215_p13, %p1214_p12 }
  0x21   :  { %p1217_p1 = pnand %p1216_p0, %p1210_p11 }
  0x23   :  { %1220 = shalt.err (!%p1217_p1)
}
  0x24   :  { %25 = dma.hbm_to_vmem [thread:$0]  %s1445_s0, 896, %s23_s16, [#allocation3]  }
  0x25   :  { %s1221_s30 = scalar_lea.hbm %s1448_s3, 1024 }
  0x26   :  { %p1222_p2 = scmp.ne.s32.totalorder %s1448_s3, %s1221_s30  ;;  %p1225_p3 = scmp.lt.u32.totalorder %s1221_s30, %s1448_s3 }
  0x28   :  { %p1227_p4 = pnand %p1225_p3, %p1222_p2 }
  0x2a   :  { %1230 = shalt.err (!%p1227_p4)
}
  0x2b   :  { %s1231_s14 = scalar_lea.vmem %s46_s18, 1024  ;;  %p1236_p6 = scmp.lt.s32.totalorder %s46_s18, %s46_s18 }
  0x2c   :  { %p1232_p5 = scmp.ne.s32.totalorder %s46_s18, %s1231_s14  ;;  %p1237_p7 = scmp.lt.s32.totalorder %s1231_s14, %s1231_s14 }
  0x2e   :  { %p1238_p8 = por %p1237_p7, %p1236_p6 }
  0x30   :  { %p1239_p9 = pnand %p1238_p8, %p1232_p5 }
  0x32   :  { %1242 = shalt.err (!%p1239_p9)
}
  0x33   :  { %51 = dma.hbm_to_vmem [thread:$0]  %s1448_s3, 1024, %s46_s18, [#allocation6], %s1296_s11, %s1296_s11, %s1297_s12  }
  0x34   :  { %s1300_s16 = smov [#allocation8]   ;;  %s1243_s21 = scalar_lea.hbm %s1450_s5, 1024 }
  0x35   :  { %s59_s17 = sshll.u32 %s1300_s16, 4  ;;  %p1244_p10 = scmp.ne.s32.totalorder %s1450_s5, %s1243_s21  ;;  %s60_s17 = int_to_ptr.vmem [resolvable:$true] %s59_s17 }
  0x36   :  { %p1247_p11 = scmp.lt.u32.totalorder %s1243_s21, %s1450_s5 }
  0x38   :  { %p1249_p12 = pnand %p1247_p11, %p1244_p10 }
  0x3a   :  { %1252 = shalt.err (!%p1249_p12)
}
  0x3b   :  { %s1253_s1 = scalar_lea.vmem %s60_s17, 1024  ;;  %p1258_p0 = scmp.lt.s32.totalorder %s60_s17, %s60_s17 }
  0x3c   :  { %p1254_p13 = scmp.ne.s32.totalorder %s60_s17, %s1253_s1  ;;  %p1259_p1 = scmp.lt.s32.totalorder %s1253_s1, %s1253_s1 }
  0x3e   :  { %p1260_p2 = por %p1259_p1, %p1258_p0 }
  0x40   :  { %p1261_p3 = pnand %p1260_p2, %p1254_p13 }
  0x42   :  { %1264 = shalt.err (!%p1261_p3)
}
  0x43   :  { %65 = dma.hbm_to_vmem [thread:$0]  %s1450_s5, 1024, %s60_s17, [#allocation9], %s1296_s11, %s1296_s11, %s1297_s12  }
  0x44   :  { %1287 = dma.done.wait [#allocation3], 896  }
  0x45   :  { %1288 = vsyncadd [#allocation3], 4294966400 }
  0x46   :  { %1289 = dma.done.wait [#allocation6], 7296  }
  0x47   :  { %1290 = vsyncadd [#allocation6], 4294960000 }
  0x48   :  { %1291 = dma.done.wait [#allocation9], 1024  }
  0x49   :  { %1292 = vsyncadd [#allocation9], 4294966272  ;;  %v1112_v0 = vld [vmem:[#allocation5 + $0x40] sm:$0xff]   ;;  %v1116_v4 = vld [vmem:[#allocation5 + $0x48] sm:$0xff]   ;;  %v1301_v44 = vmov 0.0   ;;  %vm1302_vm0 = vmmov 0  }
  0x4a   :  { %v1113_v1 = vld [vmem:[#allocation5] sm:$0xff]   ;;  %971 = vmatprep.subr.bf16.mxu0 %v1112_v0  ;;  %v1117_v5 = vld [vmem:[#allocation5 + $0x8] sm:$0xff]   ;;  %v1120_v8 = vld [vmem:[#allocation5 + $0x50] sm:$0xff]   ;;  %vm494_vm1 = vcmask 130048   ;;  %s1303_s28 = smov [#allocation10]  }
  0x4b   :  { %v1114_v2 = vld [vmem:[#allocation5 + $0xc0] sm:$0xff]   ;;  %972 = vmatpush3.bf16.msra.mxu0 %v1113_v1  ;;  %v1118_v6 = vld [vmem:[#allocation5 + $0xc8] sm:$0xff]   ;;  %v1121_v9 = vld [vmem:[#allocation5 + $0x10] sm:$0xff]   ;;  %s891_s29 = sshll.u32 %s1303_s28, 4  ;;  %s892_s29 = int_to_ptr.vmem [resolvable:$true] %s891_s29 }
  0x4c   :  { %v1115_v3 = vld [vmem:[#allocation5 + $0x80] sm:$0xff]   ;;  %993 = vmatprep.subr.bf16.mxu1 %v1114_v2  ;;  %973 = vmatprep.subr.bf16.mxu0 %v1116_v4  ;;  %v1119_v7 = vld [vmem:[#allocation5 + $0x88] sm:$0xff]   ;;  %v1122_v10 = vld [vmem:[#allocation5 + $0xd0] sm:$0xff]   ;;  %p1270_p5 = scmp.lt.s32.totalorder %s892_s29, %s892_s29 }
  0x4d   :  { %994 = vmatpush3.bf16.msra.mxu1 %v1115_v3  ;;  %v1123_v11 = vld [vmem:[#allocation5 + $0x90] sm:$0xff]   ;;  %v1124_v12 = vld [vmem:[#allocation5 + $0x58] sm:$0xff]   ;;  %v1128_v16 = vld [vmem:[#allocation5 + $0x60] sm:$0xff]  }
  0x4e   :  { %995 = vmatprep.subr.bf16.mxu1 %v1118_v6  ;;  %v1125_v13 = vld [vmem:[#allocation5 + $0x18] sm:$0xff]   ;;  %v1129_v17 = vld [vmem:[#allocation5 + $0x20] sm:$0xff]   ;;  %v1132_v20 = vld [vmem:[#allocation5 + $0x68] sm:$0xff]  }
  0x4f   :  { %974 = vmatpush3.bf16.msra.mxu0 %v1117_v5  ;;  %v1126_v14 = vld [vmem:[#allocation5 + $0xd8] sm:$0xff]   ;;  %v1130_v18 = vld [vmem:[#allocation5 + $0xe0] sm:$0xff]   ;;  %v1133_v21 = vld [vmem:[#allocation5 + $0x28] sm:$0xff]  }
  0x50   :  { %975 = vmatprep.subr.bf16.mxu0 %v1120_v8  ;;  %v1127_v15 = vld [vmem:[#allocation5 + $0x98] sm:$0xff]   ;;  %v1131_v19 = vld [vmem:[#allocation5 + $0xa0] sm:$0xff]   ;;  %v1134_v22 = vld [vmem:[#allocation5 + $0xe8] sm:$0xff]  }
  0x51   :  { %996 = vmatpush3.bf16.msra.mxu1 %v1119_v7  ;;  %v1135_v23 = vld [vmem:[#allocation5 + $0xa8] sm:$0xff]   ;;  %v1136_v24 = vld [vmem:[#allocation5 + $0x70] sm:$0xff]   ;;  %v1140_v28 = vld [vmem:[#allocation5 + $0x78] sm:$0xff]  }
  0x52   :  { %997 = vmatprep.subr.bf16.mxu1 %v1122_v10  ;;  %v1137_v25 = vld [vmem:[#allocation5 + $0x30] sm:$0xff]   ;;  %v1141_v29 = vld [vmem:[#allocation5 + $0x38] sm:$0xff]   ;;  %v81_v34 = vld [vmem:[#allocation2] sm:$0xff] }
  0x53   :  { %976 = vmatpush3.bf16.msra.mxu0 %v1121_v9  ;;  %v1138_v26 = vld [vmem:[#allocation5 + $0xf0] sm:$0xff]   ;;  %v1142_v30 = vld [vmem:[#allocation5 + $0xf8] sm:$0xff]   ;;  %v88_v35 = vpack.c.bf16 %v81_v34, %v81_v34  ;;  %v1144_v36 = vld [vmem:[#allocation5 + $0x140] sm:$0xff]  }
  0x54   :  { %977 = vmatprep.subr.bf16.mxu0 %v1124_v12  ;;  %v1139_v27 = vld [vmem:[#allocation5 + $0xb0] sm:$0xff]   ;;  %v1143_v33 = vld [vmem:[#allocation5 + $0xb8] sm:$0xff]   ;;  %v84_v37 = vld [vmem:[#allocation2 + $0x18] sm:$0xff] }
  0x55   :  { %998 = vmatpush3.bf16.msra.mxu1 %v1123_v11  ;;  %v82_v31 = vld [vmem:[#allocation2 + $0x8] sm:$0xff]  ;;  %v91_v38 = vpack.c.bf16 %v84_v37, %v84_v37  ;;  %v1145_v39 = vld [vmem:[#allocation5 + $0x100] sm:$0xff]   ;;  %v83_v40 = vld [vmem:[#allocation2 + $0x10] sm:$0xff] }
  0x56   :  { %999 = vmatprep.subr.bf16.mxu1 %v1126_v14  ;;  %v89_v32 = vpack.c.bf16 %v82_v31, %v82_v31  ;;  %v90_v41 = vpack.c.bf16 %v83_v40, %v83_v40  ;;  %v1146_v42 = vld [vmem:[#allocation5 + $0x148] sm:$0xff]   ;;  %v1148_v45 = vld [vmem:[#allocation5 + $0x150] sm:$0xff]   ;;  %v1150_v47 = vld [vmem:[#allocation5 + $0x158] sm:$0xff]  }
  0x57   :  { %978 = vmatpush3.bf16.msra.mxu0 %v1125_v13  ;;  %570 = vmatprep.mubr.bf16.mxu1 %v91_v38  ;;  %v1147_v43 = vld [vmem:[#allocation5 + $0x108] sm:$0xff]   ;;  %v1149_v46 = vld [vmem:[#allocation5 + $0x110] sm:$0xff]   ;;  %v1151_v48 = vld [vmem:[#allocation5 + $0x118] sm:$0xff]  }
  0x58   :  { %979 = vmatprep.subr.bf16.mxu0 %v1128_v16  ;;  %530 = vmatprep.mubr.bf16.mxu0 %v89_v32  ;;  %v1152_v49 = vld [vmem:[#allocation5 + $0x160] sm:$0xff]   ;;  %v1154_v51 = vld [vmem:[#allocation5 + $0x168] sm:$0xff]   ;;  %v86_v54 = vld [vmem:[#allocation2 + $0x28] sm:$0xff] }
  0x59   :  { %1000 = vmatpush3.bf16.msra.mxu1 %v1127_v15  ;;  %v1153_v50 = vld [vmem:[#allocation5 + $0x120] sm:$0xff]   ;;  %v1155_v52 = vld [vmem:[#allocation5 + $0x128] sm:$0xff]   ;;  %v1156_v55 = vld [vmem:[#allocation5 + $0x170] sm:$0xff]   ;;  %v93_v56 = vpack.c.bf16 %v86_v54, %v86_v54 }
  0x5a   :  { %1001 = vmatprep.subr.bf16.mxu1 %v1130_v18  ;;  %v1160_v53 = vld [vmem:[#allocation5 + $0x180] sm:$0xff]   ;;  %v87_v57 = vld [vmem:[#allocation2 + $0x30] sm:$0xff]  ;;  %v1157_v59 = vld [vmem:[#allocation5 + $0x130] sm:$0xff]  }
  0x5b   :  { %980 = vmatpush3.bf16.msra.mxu0 %v1129_v17  ;;  %v94_v58 = vpack.c.bf16 %v87_v57, %v87_v57  ;;  %v1158_v60 = vld [vmem:[#allocation5 + $0x178] sm:$0xff]   ;;  %v85_v62 = vld [vmem:[#allocation2 + $0x20] sm:$0xff]  ;;  %v1162_v1 = vld [vmem:[#allocation7 + $0x8] sm:$0xff]  }
  0x5c   :  { %981 = vmatprep.subr.bf16.mxu0 %v1132_v20  ;;  %v1159_v61 = vld [vmem:[#allocation5 + $0x138] sm:$0xff]   ;;  %v92_v63 = vpack.c.bf16 %v85_v62, %v85_v62  ;;  %v1161_v0 = vld [vmem:[#allocation7] sm:$0xff]   ;;  %v1164_v3 = vld [vmem:[#allocation7 + $0x18] sm:$0xff]  }
  0x5d   :  { %1002 = vmatpush3.bf16.msra.mxu1 %v1131_v19  ;;  %v1163_v2 = vld [vmem:[#allocation7 + $0x10] sm:$0xff]   ;;  %v1165_v4 = vld [vmem:[#allocation7 + $0x20] sm:$0xff]   ;;  %v1166_v5 = vld [vmem:[#allocation7 + $0x28] sm:$0xff]  }
  0x5e   :  { %1003 = vmatprep.subr.bf16.mxu1 %v1134_v22  ;;  %v1167_v6 = vld [vmem:[#allocation7 + $0x30] sm:$0xff]   ;;  %v1168_v7 = vld [vmem:[#allocation7 + $0x38] sm:$0xff]   ;;  %v1169_v8 = vld [vmem:[#allocation8] sm:$0xff]  }
  0x5f   :  { %982 = vmatpush3.bf16.msra.mxu0 %v1133_v21  ;;  %v1170_v9 = vld [vmem:[#allocation8 + $0x8] sm:$0xff]   ;;  %v1171_v10 = vld [vmem:[#allocation8 + $0x10] sm:$0xff]   ;;  %v1172_v11 = vld [vmem:[#allocation8 + $0x18] sm:$0xff]  }
  0x60   :  { %983 = vmatprep.subr.bf16.mxu0 %v1136_v24  ;;  %v1173_v12 = vld [vmem:[#allocation8 + $0x20] sm:$0xff]   ;;  %v1174_v13 = vld [vmem:[#allocation8 + $0x28] sm:$0xff]   ;;  %v1175_v40 = vld [vmem:[#allocation8 + $0x30] sm:$0xff]  }
  0x61   :  { %1004 = vmatpush3.bf16.msra.mxu1 %v1135_v23  ;;  %v902_v15 = vld [vmem:[%s1447_s2] ss:$0 sm:$0xff] }
  0x62   :  { %1005 = vmatprep.subr.bf16.mxu1 %v1138_v26 }
  0x63   :  { %984 = vmatpush3.bf16.msra.mxu0 %v1137_v25 }
  0x64   :  { %985 = vmatprep.subr.bf16.mxu0 %v1140_v28 }
  0x65   :  { %1006 = vmatpush3.bf16.msra.mxu1 %v1139_v27 }
  0x66   :  { %1007 = vmatprep.subr.bf16.mxu1 %v1142_v30 }
  0x67   :  { %986 = vmatpush3.bf16.msra.mxu0 %v1141_v29 }
  0x68   :  { %1015 = vmatprep.subr.bf16.mxu0 %v1144_v36 }
  0x69   :  { %1008 = vmatpush3.bf16.msra.mxu1 %v1143_v33 }
  0x6a   :  { %531 = vmatmul.mubr.bf16.vlgmr.msra.gmra.mrb[0].mxu0 %v88_v35  ;;  %1057 = vmatprep.subr.bf16.mxu1 %v1301_v44 }
  0x6b   :  { %1016 = vmatpush3.bf16.msra.mxu0 %v1145_v39  ;;  %610 = vmatprep.mubr.bf16.mxu0 %v93_v56 }
  0x6c   :  { %571 = vmatmul.mubr.bf16.vlgmr.msra.gmra.mrb[0].mxu1 %v90_v41  ;;  %1017 = vmatprep.subr.bf16.mxu0 %v1146_v42  ;;  %v1176_v41 = vld [vmem:[#allocation8 + $0x38] sm:$0xff]   ;;  %v953_v42 = vld [vmem:[%s1449_s4] ss:$0 sm:$0xff]  ;;  %s1265_s4 = scalar_lea.vmem %s892_s29, 128 }
  0x6d   :  { %1059 = vmatprep.mubr.msk.bf16.mxu1 %vm1302_vm0, %v1301_v44  ;;  %1058 = vmatpush3.bf16.msra.mxu1 %v1160_v53  ;;  %p1266_p4 = scmp.ne.s32.totalorder %s892_s29, %s1265_s4  ;;  %p1271_p6 = scmp.lt.s32.totalorder %s1265_s4, %s1265_s4 }
  0x6e   :  { %1063 = vmatprep.subr.bf16.mxu1 %v1301_v44 }
  0x6f   :  { %1018 = vmatpush3.bf16.msra.mxu0 %v1147_v43  ;;  %p1272_p7 = por %p1271_p6, %p1270_p5 }
  0x70   :  { %1019 = vmatprep.subr.bf16.mxu0 %v1148_v45 }
  0x71   :  { %p1273_p8 = pnand %p1272_p7, %p1266_p4 }
  0x73   :  { %1020 = vmatpush3.bf16.msra.mxu0 %v1149_v46 }
  0x74   :  { %1021 = vmatprep.subr.bf16.mxu0 %v1150_v47  ;;  %1060 = vmatmul.mubr.msk.bf16.vlgmr.msra.gmra.mrb[4].mxu1 %vm494_vm1, %v94_v58 }
  0x75   :  { %1079 = vmatprep.mubr.msk.bf16.mxu1 %vm1302_vm0, %v1301_v44  ;;  %1064 = vmatpush3.bf16.msra.mxu1 %v1161_v0 }
  0x76   :  { %1065 = vmatprep.subr.bf16.mxu1 %v1301_v44 }
  0x77   :  { %1022 = vmatpush3.bf16.msra.mxu0 %v1151_v48 }
  0x78   :  { %1023 = vmatprep.subr.bf16.mxu0 %v1152_v49 }
  0x79   :  { %1066 = vmatpush3.bf16.msra.mxu1 %v1162_v1 }
  0x7a   :  { %1067 = vmatprep.subr.bf16.mxu1 %v1301_v44 }
  0x7b   :  { %1024 = vmatpush3.bf16.msra.mxu0 %v1153_v50 }
  0x7c   :  { %1025 = vmatprep.subr.bf16.mxu0 %v1154_v51  ;;  %v962_v51 = vld [vmem:[%s1451_s6] ss:$0 sm:$0xff] }
  0x7d   :  { %1068 = vmatpush3.bf16.msra.mxu1 %v1163_v2 }
  0x7e   :  { %1069 = vmatprep.subr.bf16.mxu1 %v1301_v44 }
  0x7f   :  { %1026 = vmatpush3.bf16.msra.mxu0 %v1155_v52 }
  0x80   :  { %1027 = vmatprep.subr.bf16.mxu0 %v1156_v55 }
  0x81   :  { %1070 = vmatpush3.bf16.msra.mxu1 %v1164_v3 }
  0x82   :  { %1071 = vmatprep.subr.bf16.mxu1 %v1301_v44 }
  0x83   :  { %1028 = vmatpush3.bf16.msra.mxu0 %v1157_v59 }
  0x84   :  { %1029 = vmatprep.subr.bf16.mxu0 %v1158_v60 }
  0x85   :  { %1072 = vmatpush3.bf16.msra.mxu1 %v1165_v4 }
  0x86   :  { %1073 = vmatprep.subr.bf16.mxu1 %v1301_v44 }
  0x87   :  { %1030 = vmatpush3.bf16.msra.mxu0 %v1159_v61 }
  0x88   :  { %1083 = vmatprep.subr.bf16.mxu0 %v1301_v44 }
  0x89   :  { %1074 = vmatpush3.bf16.msra.mxu1 %v1166_v5 }
  0x8a   :  { %611 = vmatmul.mubr.bf16.vlgmr.msra.gmra.mrb[4].mxu0 %v92_v63  ;;  %1075 = vmatprep.subr.bf16.mxu1 %v1301_v44 }
  0x8b   :  { %1099 = vmatprep.mubr.msk.bf16.mxu0 %vm1302_vm0, %v1301_v44  ;;  %1084 = vmatpush3.bf16.msra.mxu0 %v1169_v8 }
  0x8c   :  { %1085 = vmatprep.subr.bf16.mxu0 %v1301_v44 }
  0x8d   :  { %1076 = vmatpush3.bf16.msra.mxu1 %v1167_v6 }
  0x8e   :  { %1077 = vmatprep.subr.bf16.mxu1 %v1301_v44 }
  0x8f   :  { %1086 = vmatpush3.bf16.msra.mxu0 %v1170_v9 }
  0x90   :  { %1087 = vmatprep.subr.bf16.mxu0 %v1301_v44 }
  0x91   :  { %1078 = vmatpush3.bf16.msra.mxu1 %v1168_v7 }
  0x93   :  { %1088 = vmatpush3.bf16.msra.mxu0 %v1171_v10 }
  0x94   :  { %1089 = vmatprep.subr.bf16.mxu0 %v1301_v44 }
  0x97   :  { %1090 = vmatpush3.bf16.msra.mxu0 %v1172_v11 }
  0x98   :  { %1091 = vmatprep.subr.bf16.mxu0 %v1301_v44 }
  0x9b   :  { %1092 = vmatpush3.bf16.msra.mxu0 %v1173_v12 }
  0x9c   :  { %1093 = vmatprep.subr.bf16.mxu0 %v1301_v44 }
  0x9f   :  { %1094 = vmatpush3.bf16.msra.mxu0 %v1174_v13 }
  0xa0   :  { %1095 = vmatprep.subr.bf16.mxu0 %v1301_v44 }
  0xa3   :  { %1096 = vmatpush3.bf16.msra.mxu0 %v1175_v40 }
  0xa4   :  { %1097 = vmatprep.subr.bf16.mxu0 %v1301_v44 }
  0xa7   :  { %1098 = vmatpush3.bf16.msra.mxu0 %v1176_v41 }
 0x13d   :  { %v987_v14 = vpop.f32.mrb[0].mxu0 }
 0x13e   :  { %v988_v16 = vpop.f32.mrb[1].mxu0 }
 0x13f   :  { %v989_v17 = vadd.f32 %v988_v16, %v987_v14  ;;  %v990_v18 = vpop.f32.mrb[2].mxu0  ;;  %v1009_v19 = vpop.f32.mrb[0].mxu1 }
 0x140   :  { %v991_v20 = vpop.f32.mrb[3].mxu0  ;;  %v1010_v22 = vpop.f32.mrb[1].mxu1 }
 0x141   :  { %v533_v21 = vadd.f32 %v989_v17, %v902_v15  ;;  %v1011_v23 = vadd.f32 %v1010_v22, %v1009_v19  ;;  %v1012_v24 = vpop.f32.mrb[2].mxu1 }
 0x142   :  { %v1013_v25 = vpop.f32.mrb[3].mxu1 }
 0x143   :  { %v573_v26 = vadd.f32 %v1011_v23, %v533_v21 }
 0x147   :  { %v652_v27 = vpop.f32.mrb[4].mxu1 }
 0x148   :  { %v1061_v28 = vpop.f32.mrb[5].mxu1 }
 0x149   :  { %v655_v29 = vpop.f32.mrb[6].mxu1 }
 0x14a   :  { %v1062_v30 = vpop.f32.mrb[7].mxu1 }
 0x15d   :  { %v1031_v31 = vpop.f32.mrb[4].mxu0 }
 0x15e   :  { %v1032_v32 = vpop.f32.mrb[5].mxu0 }
 0x15f   :  { %v1033_v33 = vadd.f32 %v1032_v32, %v1031_v31  ;;  %v1034_v34 = vpop.f32.mrb[6].mxu0 }
 0x160   :  { %v1035_v35 = vpop.f32.mrb[7].mxu0 }
 0x161   :  { %v613_v36 = vadd.f32 %v1033_v33, %v573_v26 }
 0x163   :  { %v653_v37 = vadd.f32 %v652_v27, %v613_v36 }
 0x165   :  { %v658_v38 = vmax.f32 %v653_v37, 0.0 }
 0x167   :  { %v659_v39 = vpack.c.bf16 %v658_v38, %v658_v38 }
 0x169   :  { %1080 = vmatmul.mubr.bf16.vlgmr.msra.gmra.mrb[8].mxu1 %v659_v39 }
 0x23c   :  { %v765_v43 = vpop.f32.mrb[8].mxu1 }
 0x23d   :  { %v766_v45 = vadd.f32 %v953_v42, %v765_v43  ;;  %v1081_v46 = vpop.f32.mrb[9].mxu1 }
 0x23e   :  { %v768_v47 = vpop.f32.mrb[10].mxu1 }
 0x23f   :  { %v771_v48 = vmax.f32 %v766_v45, 0.0  ;;  %v1082_v49 = vpop.f32.mrb[11].mxu1 }
 0x241   :  { %v772_v50 = vpack.c.bf16 %v771_v48, %v771_v48 }
 0x243   :  { %1100 = vmatmul.mubr.bf16.vlgmr.msra.gmra.mrb[8].mxu0 %v772_v50 }
 0x316   :  { %v878_v44 = vpop.f32.mrb[8].mxu0 }
 0x317   :  { %v879_v52 = vadd.f32 %v962_v51, %v878_v44  ;;  %v1101_v53 = vpop.f32.mrb[9].mxu0 }
 0x318   :  { %v881_v54 = vpop.f32.mrb[10].mxu0 }
 0x319   :  { %884 = vst [vmem:[#allocation10] sm:$0xff] %v879_v52  ;;  %v1102_v55 = vpop.f32.mrb[11].mxu0 }
 0x31a   :  { %1276 = shalt.err (!%p1273_p8)
}
 0x31b   :  { %s1277_s6 = scalar_lea.hbm %s1452_s7, 128 }
 0x31c   :  { %p1278_p9 = scmp.ne.s32.totalorder %s1452_s7, %s1277_s6  ;;  %p1281_p10 = scmp.lt.u32.totalorder %s1277_s6, %s1452_s7 }
 0x31e   :  { %p1283_p11 = pnand %p1281_p10, %p1278_p9 }
 0x320   :  { %1286 = shalt.err (!%p1283_p11)
}
 0x321   :  { %894 = dma.vmem_to_hbm [thread:$0]  %s892_s29, 128, %s1452_s7, [#allocation4]  }
 0x322   :  { %1293 = dma.done.wait [#allocation4], 128  }
 0x323   :  { %1294 = vsyncadd [#allocation4], 4294967168 }
 0x324   :  { %898 = vsyncpa [#allocation3], 1 }
 0x325   :  { %899 = vsyncpa [#allocation6], 1 }
 0x326   :  { %900 = vsyncpa [#allocation9], 1 }
 0x327   :  { %901 = vsyncpa [#allocation4], 1 }

</bundles_post_ra>
